<compile_context>
chip_gen: v6e
topology: v6e:2x2x1
jax: 0.10.0
libtpu: 0.0.40
codegen_flags: <defaults>
</compile_context>

<pallas_src>
import jax
import jax.numpy as jnp
from jax.experimental import pallas as pl
from jax.experimental.pallas import tpu as pltpu  # noqa: F401  (kept for the TODO path)


def _clip_embed_kernel(ids_ref, emb_ref, pos_ref, out_ref):
    # ids_ref: (N, 1) int32   flattened token ids, N = B*S (row i -> batch i//S, pos i%S)
    # emb_ref: (n_tokens, D)  token embedding table (VMEM resident)
    # pos_ref: (S, D)         positional embedding (VMEM resident)
    # out_ref: (N, D)         flattened output slab
    ids = ids_ref[...]                                    # (N, 1) int32
    n, _ = ids.shape
    n_tokens = emb_ref.shape[0]
    s = pos_ref.shape[0]

    # Fused lookup table: token rows followed by positional rows.
    table = jnp.concatenate([emb_ref[...], pos_ref[...]], axis=0)     # (n_tokens + S, D)
    k = n_tokens + s

    # Augmented one-hot: column ids[i] picks the token row, column n_tokens + (i % S)
    # picks the positional row, so one MXU matmul does gather + pos add.
    col = jax.lax.broadcasted_iota(jnp.int32, (n, k), 1)              # (N, K)
    row = jax.lax.broadcasted_iota(jnp.int32, (n, 1), 0)              # (N, 1)
    pos_col = n_tokens + (row % s)                                    # (N, 1)
    one_hot = ((col == ids) | (col == pos_col)).astype(table.dtype)   # (N, K)

    out_ref[...] = jnp.dot(one_hot, table,
                           preferred_element_type=jnp.float32).astype(out_ref.dtype)


def clip_embeddings(x, token_embedding, pos_embed):
    """out[b, s, :] = token_embedding[x[b, s], :] + pos_embed[s, :]"""
    B, S = x.shape
    n_tokens, D = token_embedding.shape
    assert pos_embed.shape == (S, D)

    N = B * S
    ids2d = x.reshape(N, 1).astype(jnp.int32)

    out_flat = pl.pallas_call(
        _clip_embed_kernel,
        out_shape=jax.ShapeDtypeStruct((N, D), token_embedding.dtype),
        grid=(1,),
        in_specs=[
            # All blocks equal the full array shapes -> (8,128) divisibility waived.
            pl.BlockSpec((N, 1), lambda i: (0, 0)),
            pl.BlockSpec((n_tokens, D), lambda i: (0, 0)),
            pl.BlockSpec((S, D), lambda i: (0, 0)),
        ],
        out_specs=pl.BlockSpec((N, D), lambda i: (0, 0)),
    )(ids2d, token_embedding, pos_embed)

    return out_flat.reshape(B, S, D)


if __name__ == "__main__":
    # Module hyperparams (small, consistent with the forward pass):
    #   n_tokens (embedding vocab) = 64, embed_dim = 32,
    #   vocab_size (= number of positions, so x is (B, vocab_size)) = 8.
    B, S, D, n_tokens = 2, 8, 32, 64

    key = jax.random.PRNGKey(0)
    k_ids, k_emb, k_pos = jax.random.split(key, 3)

    x = jax.random.randint(k_ids, (B, S), 0, n_tokens, dtype=jnp.int32)
    # Deterministic synthetic parameter init (nn.Embedding weight ~ normal;
    # pos_embed initialized nonzero so the add path is actually exercised).
    token_embedding = jax.random.normal(k_emb, (n_tokens, D), dtype=jnp.float32)
    pos_embed = 0.02 * jax.random.normal(k_pos, (S, D), dtype=jnp.float32)

    out = clip_embeddings(x, token_embedding, pos_embed)
    out = jax.block_until_ready(out)

    # Pure-JAX reference check of the PyTorch forward semantics.
    ref = token_embedding[x] + pos_embed[None, :, :]
    assert out.shape == (B, S, D)
    assert out.dtype == jnp.float32
    assert jnp.allclose(out, ref, atol=1e-6), "mismatch vs reference"

    print("KERNEL_OK")
</pallas_src>

<mosaic_0001>
module attributes {stable_mosaic.version = 11 : i64} {
  func.func @_clip_embed_kernel(%arg0: i32, %arg1: memref<16x1xi32, #tpu.memory_space<vmem>>, %arg2: memref<64x32xf32, #tpu.memory_space<vmem>>, %arg3: memref<8x32xf32, #tpu.memory_space<vmem>>, %arg4: memref<16x32xf32, #tpu.memory_space<vmem>>) attributes {dimension_semantics = [#tpu.dimension_semantics<arbitrary>], iteration_bounds = array<i64: 1>, scalar_prefetch = 0 : i64, scratch_operands = 0 : i64, tpu.core_type = #tpu.core_type<tc>, window_params = [{pipeline_mode = #tpu.pipeline_mode<synchronous>, transform_indices = @transform_0, window_bounds = array<i64: 16, 1>}, {pipeline_mode = #tpu.pipeline_mode<synchronous>, transform_indices = @transform_1, window_bounds = array<i64: 64, 32>}, {pipeline_mode = #tpu.pipeline_mode<synchronous>, transform_indices = @transform_2, window_bounds = array<i64: 8, 32>}, {pipeline_mode = #tpu.pipeline_mode<synchronous>, transform_indices = @transform_3, window_bounds = array<i64: 16, 32>}]} {
    %c0 = arith.constant 0 : index
    %c0_0 = arith.constant 0 : index
    %0 = vector.load %arg1[%c0, %c0_0] : memref<16x1xi32, #tpu.memory_space<vmem>>, vector<16x1xi32>
    %c0_1 = arith.constant 0 : index
    %c0_2 = arith.constant 0 : index
    %1 = vector.load %arg2[%c0_1, %c0_2] : memref<64x32xf32, #tpu.memory_space<vmem>>, vector<64x32xf32>
    %c0_3 = arith.constant 0 : index
    %c0_4 = arith.constant 0 : index
    %2 = vector.load %arg3[%c0_3, %c0_4] : memref<8x32xf32, #tpu.memory_space<vmem>>, vector<8x32xf32>
    %3 = tpu.concatenate %1, %2 in 0 : vector<64x32xf32>, vector<8x32xf32> -> vector<72x32xf32>
    %4 = tpu.iota {dimensions = array<i32: 1>} : vector<16x72xi32>
    %5 = tpu.iota {dimensions = array<i32: 0>} : vector<16x1xi32>
    %c8_i32 = arith.constant 8 : i32
    %c0_i32 = arith.constant 0 : i32
    %6 = arith.cmpi eq, %c8_i32, %c0_i32 : i32
    %c1_i32 = arith.constant 1 : i32
    %7 = arith.select %6, %c1_i32, %c8_i32 : i32
    %8 = vector.broadcast %7 : i32 to vector<16x1xi32>
    %9 = arith.remsi %5, %8 : vector<16x1xi32>
    %c0_i32_5 = arith.constant 0 : i32
    %10 = vector.broadcast %c0_i32_5 : i32 to vector<16x1xi32>
    %11 = arith.cmpi ne, %9, %10 : vector<16x1xi32>
    %c0_i32_6 = arith.constant 0 : i32
    %12 = vector.broadcast %c0_i32_6 : i32 to vector<16x1xi32>
    %13 = arith.cmpi slt, %9, %12 : vector<16x1xi32>
    %c0_i32_7 = arith.constant 0 : i32
    %14 = arith.cmpi slt, %7, %c0_i32_7 : i32
    %15 = vector.broadcast %14 : i1 to vector<16x1xi1>
    %16 = vector.broadcast %15 : vector<16x1xi1> to vector<16x1xi1>
    %17 = arith.xori %13, %16 : vector<16x1xi1>
    %18 = arith.andi %17, %11 : vector<16x1xi1>
    %19 = vector.broadcast %7 : i32 to vector<16x1xi32>
    %20 = arith.addi %9, %19 : vector<16x1xi32>
    %21 = arith.select %18, %20, %9 : vector<16x1xi1>, vector<16x1xi32>
    %c64_i32 = arith.constant 64 : i32
    %22 = vector.broadcast %c64_i32 : i32 to vector<16x1xi32>
    %23 = arith.addi %22, %21 : vector<16x1xi32>
    %24 = vector.broadcast %0 : vector<16x1xi32> to vector<16x72xi32>
    %25 = arith.cmpi eq, %4, %24 : vector<16x72xi32>
    %26 = vector.broadcast %23 : vector<16x1xi32> to vector<16x72xi32>
    %27 = arith.cmpi eq, %4, %26 : vector<16x72xi32>
    %28 = arith.ori %25, %27 : vector<16x72xi1>
    %29 = arith.extui %28 : vector<16x72xi1> to vector<16x72xi32>
    %30 = arith.sitofp %29 : vector<16x72xi32> to vector<16x72xf32>
    %cst = arith.constant dense<0.000000e+00> : vector<16x32xf32>
    %31 = tpu.matmul %30, %3, %cst {dimension_numbers = #tpu.dot_dimension_numbers<[1], [0], [0], [1], [0, 0, 1, 1], [], []>} : vector<16x72xf32>, vector<72x32xf32>, vector<16x32xf32> -> vector<16x32xf32>
    %c0_8 = arith.constant 0 : index
    %c0_9 = arith.constant 0 : index
    %32 = vector.load %arg4[%c0_8, %c0_9] : memref<16x32xf32, #tpu.memory_space<vmem>>, vector<16x32xf32>
    tpu.vector_store %arg4[%c0_8, %c0_9], %31 {strides = array<i32>} : memref<16x32xf32, #tpu.memory_space<vmem>>, vector<16x32xf32>,
    return
  }
  func.func @transform_0(%arg0: i32) -> (i32, i32) {
    %c0_i32 = arith.constant 0 : i32
    %c0_i32_0 = arith.constant 0 : i32
    %c0_i32_1 = arith.constant 0 : i32
    return %c0_i32, %c0_i32_0 : i32, i32
  }
  func.func @transform_1(%arg0: i32) -> (i32, i32) {
    %c0_i32 = arith.constant 0 : i32
    %c0_i32_0 = arith.constant 0 : i32
    %c0_i32_1 = arith.constant 0 : i32
    return %c0_i32, %c0_i32_0 : i32, i32
  }
  func.func @transform_2(%arg0: i32) -> (i32, i32) {
    %c0_i32 = arith.constant 0 : i32
    %c0_i32_0 = arith.constant 0 : i32
    %c0_i32_1 = arith.constant 0 : i32
    return %c0_i32, %c0_i32_0 : i32, i32
  }
  func.func @transform_3(%arg0: i32) -> (i32, i32) {
    %c0_i32 = arith.constant 0 : i32
    %c0_i32_0 = arith.constant 0 : i32
    %c0_i32_1 = arith.constant 0 : i32
    return %c0_i32, %c0_i32_0 : i32, i32
  }
}

</mosaic_0001>

<bundles_post_ra>
// kernel: tpu_custom_call.1
= control target key start
LH: loop header
LB: loop body
LE: loop exit
PB: predicated region body
PF: predicated region fallthrough
CT: control target
= control target key end

     0   :  { %v238_v2 = vmov 0   ;;  %s299_s0 = inlined_call_operand.vmem [shape: s32[16,1], index: 0, kind: input, shape index: {}]   ;;  %s300_s1 = inlined_call_operand.vmem [shape: f32[64,32], index: 1, kind: input, shape index: {}]   ;;  %s301_s2 = inlined_call_operand.vmem [shape: f32[8,32], index: 2, kind: input, shape index: {}]   ;;  %s302_s3 = inlined_call_operand.hbm [shape: f32[16,32], index: 3, kind: output, shape index: {}]  }
   0x1   :  { %v15_v0 = vld [vmem:[%s299_s0] sm:$0xff]  ;;  %215 = vset.pattern.permute.xlu0 %v238_v2  ;;  %v24_v3 = vld [vmem:[%s300_s1 + $0x38] sm:$0xff]  ;;  %v23_v4 = vld [vmem:[%s300_s1 + $0x30] sm:$0xff] }
   0x2   :  { %v25_v1 = vld [vmem:[%s301_s2] sm:$0xff]  ;;  %58 = vperm.xlu0 %215, %v15_v0   ;;  %v16_v5 = vld [vmem:[%s299_s0 + $0x8] sm:$0xff] }
   0x3   :  { %189 = vmatprep.subr.mxu0 %v25_v1 }
   0x4   :  { %190 = vmatpush3.msra.mxu0 %v25_v1 }
   0x5   :  { %191 = vmatprep.subr.mxu0 %v24_v3 }
   0x6   :  { %8 = vsyncpa [#allocation3], 0  ;;  %192 = vmatpush3.msra.mxu0 %v24_v3  ;;  %v22_v6 = vld [vmem:[%s300_s1 + $0x28] sm:$0xff]  ;;  %61 = vperm.xlu0 %215, %v16_v5   ;;  %v21_v7 = vld [vmem:[%s300_s1 + $0x20] sm:$0xff]  ;;  %v26_v12 = vlaneseq  ;;  %vm73_vm2 = vcmask 588800   ;;  %v239_v21 = vmov 0.0  }
   0x7   :  { %193 = vmatprep.subr.mxu0 %v23_v4  ;;  %v20_v8 = vld [vmem:[%s300_s1 + $0x18] sm:$0xff]  ;;  %v19_v9 = vld [vmem:[%s300_s1 + $0x10] sm:$0xff]  ;;  %v18_v10 = vld [vmem:[%s300_s1 + $0x8] sm:$0xff]  ;;  %vm155_vm7 = vcmask 261120  }
   0x8   :  { %194 = vmatpush3.msra.mxu0 %v23_v4  ;;  %v17_v11 = vld [vmem:[%s300_s1] sm:$0xff]  ;;  %v29_v13 = vshrl.u32 %v26_v12, 7  ;;  %v27_v16 = vand.u32 127, %v26_v12  ;;  %s240_s1 = smov [#allocation2]  }
   0x9   :  { %195 = vmatprep.subr.mxu0 %v22_v6  ;;  %s163_s5 = sshll.u32 %s240_s1, 4  ;;  %s164_s5 = int_to_ptr.vmem [resolvable:$true] %s163_s5 }
   0xa   :  { %196 = vmatpush3.msra.mxu0 %v22_v6  ;;  %v35_v14 = vand.u32 7, %v29_v13  ;;  %v30_v15 = vadd.s32 8, %v29_v13  ;;  %s216_s6 = scalar_lea.vmem %s164_s5, 256  ;;  %p221_p1 = scmp.lt.s32.totalorder %s164_s5, %s164_s5 }
   0xb   :  { %197 = vmatprep.subr.mxu0 %v21_v7  ;;  %p217_p0 = scmp.ne.s32.totalorder %s164_s5, %s216_s6  ;;  %p222_p2 = scmp.lt.s32.totalorder %s216_s6, %s216_s6 }
   0xc   :  { %198 = vmatpush3.msra.mxu0 %v21_v7  ;;  %v55_v17 = vadd.s32 64, %v35_v14  ;;  %v42_v18 = vand.u32 7, %v30_v15 }
   0xd   :  { %199 = vmatprep.subr.mxu0 %v20_v8  ;;  %p223_p3 = por %p222_p2, %p221_p1 }
   0xe   :  { %200 = vmatpush3.msra.mxu0 %v20_v8  ;;  %vm65_vm0 = vcmp.eq.s32.totalorder %v27_v16, %v55_v17  ;;  %v56_v19 = vadd.s32 64, %v42_v18 }
   0xf   :  { %201 = vmatprep.subr.mxu0 %v19_v9  ;;  %p224_p4 = pnand %p223_p3, %p217_p0 }
  0x10   :  { %202 = vmatpush3.msra.mxu0 %v19_v9  ;;  %vm66_vm4 = vcmp.eq.s32.totalorder %v27_v16, %v56_v19 }
  0x11   :  { %203 = vmatprep.subr.mxu0 %v18_v10 }
  0x12   :  { %204 = vmatpush3.msra.mxu0 %v18_v10 }
  0x13   :  { %205 = vmatprep.subr.mxu0 %v17_v11 }
  0x14   :  { %206 = vmatpush3.msra.mxu0 %v17_v11 }
  0x7d   :  { %v59_v20 = vpop.permute.xlu0 %58 }
  0x7e   :  { %vm63_vm1 = vcmp.eq.s32.totalorder %v27_v16, %v59_v20 }
  0x7f   :  { %vm67_vm3 = vmor %vm63_vm1, %vm65_vm0 }
  0x80   :  { %v174_v22 = vsel %vm67_vm3, 1.0, %v239_v21 }
  0x81   :  { %207 = vmatprep.mubr.msk.f32.mxu0 %vm73_vm2, %v174_v22  ;;  %v62_v23 = vpop.permute.xlu0 %61 }
  0x82   :  { %vm64_vm5 = vcmp.eq.s32.totalorder %v27_v16, %v62_v23 }
  0x83   :  { %vm68_vm6 = vmor %vm64_vm5, %vm66_vm4 }
  0x84   :  { %v175_v24 = vsel %vm68_vm6, 1.0, %v239_v21 }
  0x85   :  { %208 = vmatmul.mubr.msk.f32.vlgmr.msra.gmra.mxu0 %vm73_vm2, %v175_v24 }
 0x145   :  { %v209_v25 = vpop.f32.mrf.mxu0 }
 0x146   :  { %157 = vst.msk [vmem:[#allocation2 + $0x8] sm:$0xff] %vm155_vm7, %v209_v25 }
 0x147   :  { %v146_v26 = vpop.f32.mrf.mxu0 }
 0x148   :  { %156 = vst.msk [vmem:[#allocation2] sm:$0xff] %vm155_vm7, %v146_v26 }
 0x149   :  { %227 = shalt.err (!%p224_p4)
}
 0x14a   :  { %s241_s7 = smov 128   ;;  %s242_s8 = smov 8  }
 0x14b   :  { %169 = dma.vmem_to_hbm [thread:$0]  %s164_s5, 256, %s302_s3, [#allocation3], %s241_s7, %s241_s7, %s242_s8  }
 0x14c   :  { %236 = dma.done.wait [#allocation3], 256  }
 0x14d   :  { %237 = vsyncadd [#allocation3], 4294967040 }
 0x14e   :  { %173 = vsyncpa [#allocation3], 1 }

</bundles_post_ra>
